<compile_context>
chip_gen: v7x
topology: tpu7x:2x2x1
jax: 0.10.0
libtpu: 0.0.40
codegen_flags: <defaults>
</compile_context>

<pallas_src>
import functools

import jax
import jax.numpy as jnp
from jax.experimental import pallas as pl
from jax.experimental.pallas import tpu as pltpu


def _round_up(x, m):
    return ((x + m - 1) // m) * m


def _pick_tq(n_pad, c_pad, budget_bytes=20 * 1024 * 1024):
    """Largest row tile (multiple of 128, dividing n_pad) within the VMEM budget."""
    for tq in (1024, 512, 256, 128):
        if n_pad % tq:
            continue
        tile_bytes = (
            4 * c_pad * n_pad * 4      # resident x slab + out accumulator block
            + 2 * c_pad * tq * 4       # x row tile (double buffered)
            + 2 * tq * n_pad * 4       # attention output block (double buffered)
            + 3 * tq * n_pad * 4       # energy / exp / attn temporaries
        )
        if tile_bytes <= budget_bytes:
            return tq
    return 128


def _self_attn_kernel(x_ref, xt_ref, wq_ref, bq_ref, wk_ref, bk_ref,
                      wv_ref, bv_ref, gamma_ref, out_ref, attn_ref,
                      *, n_real, n_pad, tq, use_bf16):
    f32 = jnp.float32
    i = pl.program_id(1)
    n_steps = pl.num_programs(1)

    x = x_ref[0]        # (C_pad, N_pad)  full slab, resident across i
    x_t = xt_ref[0]     # (C_pad, TQ)     this step's row tile of x

    # 1x1 convs == channel matmuls with bias broadcast over positions.
    k = jnp.dot(wk_ref[...], x, preferred_element_type=f32) + bk_ref[...]      # (dk, N)
    q_t = jnp.dot(wq_ref[...], x_t, preferred_element_type=f32) + bq_ref[...]  # (dk, TQ)
    v_t = jnp.dot(wv_ref[...], x_t, preferred_element_type=f32) + bv_ref[...]  # (C,  TQ)

    # energy[r, c] = sum_d Q[d, r] * K[d, c]: contract over axis 0 of both
    # operands — no transposed (N, dk) tile is materialized.
    mm_dtype = jnp.bfloat16 if use_bf16 else f32
    energy = jax.lax.dot_general(
        q_t.astype(mm_dtype), k.astype(mm_dtype),
        dimension_numbers=(((0,), (0,)), ((), ())),
        preferred_element_type=f32)                                            # (TQ, N_pad)

    if n_real < n_pad:
        # Padded key columns must not participate in the softmax.
        col = jax.lax.broadcasted_iota(jnp.int32, (tq, n_pad), 1)
        energy = jnp.where(col < n_real, energy, jnp.float32(-1e30))

    # Numerically stable softmax over the key axis (f32); normalize with an
    # EUP reciprocal instead of a VALU divide.
    m = jnp.max(energy, axis=-1, keepdims=True)
    e = jnp.exp(energy - m)
    s = jnp.sum(e, axis=-1, keepdims=True)
    attn = e * pl.reciprocal(s, approx=False)                                  # (TQ, N_pad)

    attn_ref[0] = attn

    # out[c, pos] = sum_j V[c, j] * attn[j, pos]; this step contributes the
    # rows j in [i*TQ, (i+1)*TQ).  Zero padded value columns so they don't leak.
    if n_real < n_pad:
        jpos = i * tq + jax.lax.broadcasted_iota(jnp.int32, v_t.shape, 1)
        v_t = jnp.where(jpos < n_real, v_t, 0.0)

    contrib = jnp.dot(v_t.astype(mm_dtype), attn.astype(mm_dtype),
                      preferred_element_type=f32)                              # (C, N_pad)

    # Output block is resident across the "arbitrary" i axis -> accumulator.
    @pl.when(i == 0)
    def _init():
        out_ref[0] = jnp.zeros_like(out_ref[0])

    out_ref[0] += contrib

    @pl.when(i == n_steps - 1)
    def _finalize():
        out_ref[0] = gamma_ref[0] * out_ref[0] + x


def self_attn(x, wq, bq, wk, bk, wv, bv, gamma, *, use_bf16_matmul=False):
    """x: (B, C, W, H).  Returns (out (B, C, W, H), attention (B, N, N))."""
    f32 = jnp.float32
    B, C, W, H = x.shape
    N = W * H
    dk = wq.shape[0]

    n_pad = _round_up(N, 128)
    c_pad = _round_up(C, 8)
    dk_pad = _round_up(dk, 8)

    x_flat = jnp.pad(x.reshape(B, C, N).astype(f32),
                     ((0, 0), (0, c_pad - C), (0, n_pad - N)))
    wq_p = jnp.pad(wq.astype(f32), ((0, dk_pad - dk), (0, c_pad - C)))
    wk_p = jnp.pad(wk.astype(f32), ((0, dk_pad - dk), (0, c_pad - C)))
    wv_p = jnp.pad(wv.astype(f32), ((0, c_pad - C), (0, c_pad - C)))
    bq_p = jnp.pad(bq.astype(f32), ((0, dk_pad - dk),)).reshape(dk_pad, 1)
    bk_p = jnp.pad(bk.astype(f32), ((0, dk_pad - dk),)).reshape(dk_pad, 1)
    bv_p = jnp.pad(bv.astype(f32), ((0, c_pad - C),)).reshape(c_pad, 1)
    gamma1 = gamma.reshape(1).astype(f32)

    tq = _pick_tq(n_pad, c_pad)
    n_steps = n_pad // tq

    kernel = functools.partial(_self_attn_kernel, n_real=N, n_pad=n_pad,
                               tq=tq, use_bf16=use_bf16_matmul)

    out, attn = pl.pallas_call(
        kernel,
        out_shape=(jax.ShapeDtypeStruct((B, c_pad, n_pad), f32),
                   jax.ShapeDtypeStruct((B, n_pad, n_pad), f32)),
        grid=(B, n_steps),
        in_specs=[
            pl.BlockSpec((1, c_pad, n_pad), lambda b, i: (b, 0, 0)),   # x (resident)
            pl.BlockSpec((1, c_pad, tq), lambda b, i: (b, 0, i)),      # x row tile
            pl.BlockSpec((dk_pad, c_pad), lambda b, i: (0, 0)),        # Wq
            pl.BlockSpec((dk_pad, 1), lambda b, i: (0, 0)),            # bq
            pl.BlockSpec((dk_pad, c_pad), lambda b, i: (0, 0)),        # Wk
            pl.BlockSpec((dk_pad, 1), lambda b, i: (0, 0)),            # bk
            pl.BlockSpec((c_pad, c_pad), lambda b, i: (0, 0)),         # Wv
            pl.BlockSpec((c_pad, 1), lambda b, i: (0, 0)),             # bv
            pl.BlockSpec(memory_space=pltpu.MemorySpace.SMEM),         # gamma scalar
        ],
        out_specs=(
            pl.BlockSpec((1, c_pad, n_pad), lambda b, i: (b, 0, 0)),   # out / accumulator
            pl.BlockSpec((1, tq, n_pad), lambda b, i: (b, i, 0)),      # attention rows
        ),
        compiler_params=pltpu.CompilerParams(
            dimension_semantics=("parallel", "arbitrary"),
            vmem_limit_bytes=48 * 1024 * 1024),
    )(x_flat, x_flat, wq_p, bq_p, wk_p, bk_p, wv_p, bv_p, gamma1)

    out = out[:, :C, :N].reshape(B, C, W, H)
    attn = attn[:, :N, :N]
    return out, attn


def self_attn_ref(x, wq, bq, wk, bk, wv, bv, gamma):
    """Pure-JAX reference mirroring the PyTorch forward exactly."""
    B, C, W, H = x.shape
    N = W * H
    xf = x.reshape(B, C, N)
    q = jnp.einsum("kc,bcn->bkn", wq, xf) + bq[None, :, None]   # (B, dk, N)
    k = jnp.einsum("kc,bcn->bkn", wk, xf) + bk[None, :, None]   # (B, dk, N)
    v = jnp.einsum("oc,bcn->bon", wv, xf) + bv[None, :, None]   # (B, C,  N)
    energy = jnp.einsum("bki,bkj->bij", q, k)                   # bmm(Q^T, K)
    attn = jax.nn.softmax(energy, axis=-1)
    out = jnp.einsum("bcj,bji->bci", v, attn)                   # bmm(V, attn)
    out = gamma.reshape(()) * out + xf
    return out.reshape(B, C, W, H), attn


if __name__ == "__main__":
    # Small shapes consistent with the module: B=2, feature_size=8,
    # spatial 8x8 (N=64), dim_k=4.
    B, C, W, H, dk = 2, 8, 8, 8, 4

    key = jax.random.PRNGKey(0)
    kx, kq, kbq, kk, kbk, kv, kbv = jax.random.split(key, 7)

    x = jax.random.normal(kx, (B, C, W, H), dtype=jnp.float32)
    wq = jax.random.normal(kq, (dk, C), dtype=jnp.float32) * 0.1
    bq = jax.random.normal(kbq, (dk,), dtype=jnp.float32) * 0.1
    wk = jax.random.normal(kk, (dk, C), dtype=jnp.float32) * 0.1
    bk = jax.random.normal(kbk, (dk,), dtype=jnp.float32) * 0.1
    wv = jax.random.normal(kv, (C, C), dtype=jnp.float32) * 0.1
    bv = jax.random.normal(kbv, (C,), dtype=jnp.float32) * 0.1
    gamma = jnp.zeros((1,), dtype=jnp.float32)  # nn.Parameter(torch.zeros(1))

    # Exact (f32) path.
    out, attn = self_attn(x, wq, bq, wk, bk, wv, bv, gamma)
    out = jax.block_until_ready(out)
    attn = jax.block_until_ready(attn)
    out_r, attn_r = self_attn_ref(x, wq, bq, wk, bk, wv, bv, gamma)
    assert jnp.allclose(out, out_r, atol=1e-5, rtol=1e-5)
    assert jnp.allclose(attn, attn_r, atol=1e-5, rtol=1e-5)

    # Nonzero gamma so the attention-output path is exercised.
    gamma2 = jnp.array([0.5], dtype=jnp.float32)
    out2, attn2 = self_attn(x, wq, bq, wk, bk, wv, bv, gamma2)
    out2_r, attn2_r = self_attn_ref(x, wq, bq, wk, bk, wv, bv, gamma2)
    assert jnp.allclose(jax.block_until_ready(out2), out2_r, atol=1e-5, rtol=1e-5)

    # bf16 MXU fast path (v6e/v7x); softmax stays f32, looser tolerance.
    out3, attn3 = self_attn(x, wq, bq, wk, bk, wv, bv, gamma2,
                            use_bf16_matmul=True)
    assert jnp.allclose(jax.block_until_ready(out3), out2_r, atol=2e-2, rtol=2e-2)
    assert jnp.allclose(jax.block_until_ready(attn3), attn2_r, atol=2e-2, rtol=2e-2)

    print("KERNEL_OK")
</pallas_src>

<mosaic_0001>
module attributes {stable_mosaic.version = 11 : i64} {
  func.func @_self_attn_kernel(%arg0: i32, %arg1: i32, %arg2: memref<1x8x128xf32, #tpu.memory_space<vmem>>, %arg3: memref<1x8x128xf32, #tpu.memory_space<vmem>>, %arg4: memref<8x8xf32, #tpu.memory_space<vmem>>, %arg5: memref<8x1xf32, #tpu.memory_space<vmem>>, %arg6: memref<8x8xf32, #tpu.memory_space<vmem>>, %arg7: memref<8x1xf32, #tpu.memory_space<vmem>>, %arg8: memref<8x8xf32, #tpu.memory_space<vmem>>, %arg9: memref<8x1xf32, #tpu.memory_space<vmem>>, %arg10: memref<1xf32, #tpu.memory_space<smem>>, %arg11: memref<1x8x128xf32, #tpu.memory_space<vmem>>, %arg12: memref<1x128x128xf32, #tpu.memory_space<vmem>>) attributes {dimension_semantics = [#tpu.dimension_semantics<parallel>, #tpu.dimension_semantics<arbitrary>], iteration_bounds = array<i64: 2, 1>, scalar_prefetch = 0 : i64, scratch_operands = 0 : i64, tpu.core_type = #tpu.core_type<tc>, window_params = [{transform_indices = @transform_0, window_bounds = array<i64: 1, 8, 128>}, {transform_indices = @transform_1, window_bounds = array<i64: 1, 8, 128>}, {pipeline_mode = #tpu.pipeline_mode<synchronous>, transform_indices = @transform_2, window_bounds = array<i64: 8, 8>}, {pipeline_mode = #tpu.pipeline_mode<synchronous>, transform_indices = @transform_3, window_bounds = array<i64: 8, 1>}, {pipeline_mode = #tpu.pipeline_mode<synchronous>, transform_indices = @transform_4, window_bounds = array<i64: 8, 8>}, {pipeline_mode = #tpu.pipeline_mode<synchronous>, transform_indices = @transform_5, window_bounds = array<i64: 8, 1>}, {pipeline_mode = #tpu.pipeline_mode<synchronous>, transform_indices = @transform_6, window_bounds = array<i64: 8, 8>}, {pipeline_mode = #tpu.pipeline_mode<synchronous>, transform_indices = @transform_7, window_bounds = array<i64: 8, 1>}, {transform_indices = @transform_8, window_bounds = array<i64: 1>}, {transform_indices = @transform_9, window_bounds = array<i64: 1, 8, 128>}, {transform_indices = @transform_10, window_bounds = array<i64: 1, 128, 128>}]} {
    %c0 = arith.constant 0 : index
    %c0_0 = arith.constant 0 : index
    %c0_1 = arith.constant 0 : index
    %0 = vector.load %arg2[%c0, %c0_0, %c0_1] : memref<1x8x128xf32, #tpu.memory_space<vmem>>, vector<1x8x128xf32>
    %1 = vector.shape_cast %0 : vector<1x8x128xf32> to vector<8x128xf32>
    %c0_2 = arith.constant 0 : index
    %c0_3 = arith.constant 0 : index
    %c0_4 = arith.constant 0 : index
    %2 = vector.load %arg3[%c0_2, %c0_3, %c0_4] : memref<1x8x128xf32, #tpu.memory_space<vmem>>, vector<1x8x128xf32>
    %3 = vector.shape_cast %2 : vector<1x8x128xf32> to vector<8x128xf32>
    %c0_5 = arith.constant 0 : index
    %c0_6 = arith.constant 0 : index
    %4 = vector.load %arg6[%c0_5, %c0_6] : memref<8x8xf32, #tpu.memory_space<vmem>>, vector<8x8xf32>
    %cst = arith.constant dense<0.000000e+00> : vector<8x128xf32>
    %5 = tpu.matmul %4, %1, %cst {dimension_numbers = #tpu.dot_dimension_numbers<[1], [0], [0], [1], [0, 0, 1, 1], [], []>} : vector<8x8xf32>, vector<8x128xf32>, vector<8x128xf32> -> vector<8x128xf32>
    %c0_7 = arith.constant 0 : index
    %c0_8 = arith.constant 0 : index
    %6 = vector.load %arg7[%c0_7, %c0_8] : memref<8x1xf32, #tpu.memory_space<vmem>>, vector<8x1xf32>
    %7 = vector.broadcast %6 : vector<8x1xf32> to vector<8x128xf32>
    %8 = arith.addf %5, %7 : vector<8x128xf32>
    %c0_9 = arith.constant 0 : index
    %c0_10 = arith.constant 0 : index
    %9 = vector.load %arg4[%c0_9, %c0_10] : memref<8x8xf32, #tpu.memory_space<vmem>>, vector<8x8xf32>
    %cst_11 = arith.constant dense<0.000000e+00> : vector<8x128xf32>
    %10 = tpu.matmul %9, %3, %cst_11 {dimension_numbers = #tpu.dot_dimension_numbers<[1], [0], [0], [1], [0, 0, 1, 1], [], []>} : vector<8x8xf32>, vector<8x128xf32>, vector<8x128xf32> -> vector<8x128xf32>
    %c0_12 = arith.constant 0 : index
    %c0_13 = arith.constant 0 : index
    %11 = vector.load %arg5[%c0_12, %c0_13] : memref<8x1xf32, #tpu.memory_space<vmem>>, vector<8x1xf32>
    %12 = vector.broadcast %11 : vector<8x1xf32> to vector<8x128xf32>
    %13 = arith.addf %10, %12 : vector<8x128xf32>
    %c0_14 = arith.constant 0 : index
    %c0_15 = arith.constant 0 : index
    %14 = vector.load %arg8[%c0_14, %c0_15] : memref<8x8xf32, #tpu.memory_space<vmem>>, vector<8x8xf32>
    %cst_16 = arith.constant dense<0.000000e+00> : vector<8x128xf32>
    %15 = tpu.matmul %14, %3, %cst_16 {dimension_numbers = #tpu.dot_dimension_numbers<[1], [0], [0], [1], [0, 0, 1, 1], [], []>} : vector<8x8xf32>, vector<8x128xf32>, vector<8x128xf32> -> vector<8x128xf32>
    %c0_17 = arith.constant 0 : index
    %c0_18 = arith.constant 0 : index
    %16 = vector.load %arg9[%c0_17, %c0_18] : memref<8x1xf32, #tpu.memory_space<vmem>>, vector<8x1xf32>
    %17 = vector.broadcast %16 : vector<8x1xf32> to vector<8x128xf32>
    %18 = arith.addf %15, %17 : vector<8x128xf32>
    %cst_19 = arith.constant dense<0.000000e+00> : vector<128x128xf32>
    %19 = tpu.matmul %13, %8, %cst_19 {dimension_numbers = #tpu.dot_dimension_numbers<[0], [0], [1], [1], [0, 1, 1, 1], [], []>} : vector<8x128xf32>, vector<8x128xf32>, vector<128x128xf32> -> vector<128x128xf32>
    %20 = tpu.iota {dimensions = array<i32: 1>} : vector<128x128xi32>
    %c64_i32 = arith.constant 64 : i32
    %21 = vector.broadcast %c64_i32 : i32 to vector<128x128xi32>
    %22 = arith.cmpi slt, %20, %21 : vector<128x128xi32>
    %cst_20 = arith.constant -1.000000e+30 : f32
    %23 = vector.broadcast %cst_20 : f32 to vector<128x128xf32>
    %24 = arith.select %22, %19, %23 : vector<128x128xi1>, vector<128x128xf32>
    %cst_21 = arith.constant dense<0xFF800000> : vector<128xf32>
    %25 = vector.multi_reduction <maximumf>, %24, %cst_21 [1] : vector<128x128xf32> to vector<128xf32>
    %26 = vector.shape_cast %25 : vector<128xf32> to vector<128x1xf32>
    %27 = vector.broadcast %26 : vector<128x1xf32> to vector<128x128xf32>
    %28 = arith.subf %24, %27 : vector<128x128xf32>
    %29 = math.exp %28 : vector<128x128xf32>
    %cst_22 = arith.constant dense<0.000000e+00> : vector<128xf32>
    %30 = vector.multi_reduction <add>, %29, %cst_22 [1] : vector<128x128xf32> to vector<128xf32>
    %31 = vector.shape_cast %30 : vector<128xf32> to vector<128x1xf32>
    %32 = tpu.reciprocal %31 : vector<128x1xf32> -> vector<128x1xf32>
    %33 = vector.broadcast %32 : vector<128x1xf32> to vector<128x128xf32>
    %34 = arith.mulf %29, %33 : vector<128x128xf32>
    %c0_23 = arith.constant 0 : index
    %c0_24 = arith.constant 0 : index
    %c0_25 = arith.constant 0 : index
    %35 = vector.load %arg12[%c0_23, %c0_24, %c0_25] : memref<1x128x128xf32, #tpu.memory_space<vmem>>, vector<1x128x128xf32>
    %36 = vector.shape_cast %35 : vector<1x128x128xf32> to vector<128x128xf32>
    %37 = vector.shape_cast %34 : vector<128x128xf32> to vector<1x128x128xf32>
    tpu.vector_store %arg12[%c0_23, %c0_24, %c0_25], %37 {strides = array<i32>} : memref<1x128x128xf32, #tpu.memory_space<vmem>>, vector<1x128x128xf32>,
    %c128_i32 = arith.constant 128 : i32
    %38 = arith.muli %arg1, %c128_i32 : i32
    %39 = tpu.iota {dimensions = array<i32: 1>} : vector<8x128xi32>
    %40 = vector.broadcast %38 : i32 to vector<8x128xi32>
    %41 = arith.addi %40, %39 : vector<8x128xi32>
    %c64_i32_26 = arith.constant 64 : i32
    %42 = vector.broadcast %c64_i32_26 : i32 to vector<8x128xi32>
    %43 = arith.cmpi slt, %41, %42 : vector<8x128xi32>
    %cst_27 = arith.constant 0.000000e+00 : f32
    %44 = vector.broadcast %cst_27 : f32 to vector<8x128xf32>
    %45 = arith.select %43, %18, %44 : vector<8x128xi1>, vector<8x128xf32>
    %cst_28 = arith.constant dense<0.000000e+00> : vector<8x128xf32>
    %46 = tpu.matmul %45, %34, %cst_28 {dimension_numbers = #tpu.dot_dimension_numbers<[1], [0], [0], [1], [0, 0, 1, 1], [], []>} : vector<8x128xf32>, vector<128x128xf32>, vector<8x128xf32> -> vector<8x128xf32>
    %c0_i32 = arith.constant 0 : i32
    %47 = arith.cmpi eq, %arg1, %c0_i32 : i32
    %48 = arith.extui %47 : i1 to i32
    %c0_i32_29 = arith.constant 0 : i32
    %49 = arith.cmpi ne, %48, %c0_i32_29 : i32
    scf.if %49 {
      %cst_38 = arith.constant 0.000000e+00 : f32
      %59 = vector.broadcast %cst_38 : f32 to vector<8x128xf32>
      %c0_39 = arith.constant 0 : index
      %c0_40 = arith.constant 0 : index
      %c0_41 = arith.constant 0 : index
      %60 = vector.load %arg11[%c0_39, %c0_40, %c0_41] : memref<1x8x128xf32, #tpu.memory_space<vmem>>, vector<1x8x128xf32>
      %61 = vector.shape_cast %60 : vector<1x8x128xf32> to vector<8x128xf32>
      %62 = vector.shape_cast %59 : vector<8x128xf32> to vector<1x8x128xf32>
      tpu.vector_store %arg11[%c0_39, %c0_40, %c0_41], %62 {strides = array<i32>} : memref<1x8x128xf32, #tpu.memory_space<vmem>>, vector<1x8x128xf32>,
    } else {
    }
    %c0_30 = arith.constant 0 : index
    %c0_31 = arith.constant 0 : index
    %c0_32 = arith.constant 0 : index
    %50 = vector.load %arg11[%c0_30, %c0_31, %c0_32] : memref<1x8x128xf32, #tpu.memory_space<vmem>>, vector<1x8x128xf32>
    %51 = vector.shape_cast %50 : vector<1x8x128xf32> to vector<8x128xf32>
    %52 = arith.addf %51, %46 : vector<8x128xf32>
    %c0_33 = arith.constant 0 : index
    %c0_34 = arith.constant 0 : index
    %c0_35 = arith.constant 0 : index
    %53 = vector.load %arg11[%c0_33, %c0_34, %c0_35] : memref<1x8x128xf32, #tpu.memory_space<vmem>>, vector<1x8x128xf32>
    %54 = vector.shape_cast %53 : vector<1x8x128xf32> to vector<8x128xf32>
    %55 = vector.shape_cast %52 : vector<8x128xf32> to vector<1x8x128xf32>
    tpu.vector_store %arg11[%c0_33, %c0_34, %c0_35], %55 {strides = array<i32>} : memref<1x8x128xf32, #tpu.memory_space<vmem>>, vector<1x8x128xf32>,
    %c0_i32_36 = arith.constant 0 : i32
    %56 = arith.cmpi eq, %arg1, %c0_i32_36 : i32
    %57 = arith.extui %56 : i1 to i32
    %c0_i32_37 = arith.constant 0 : i32
    %58 = arith.cmpi ne, %57, %c0_i32_37 : i32
    scf.if %58 {
      %c0_38 = arith.constant 0 : index
      %59 = memref.load %arg10[%c0_38] : memref<1xf32, #tpu.memory_space<smem>>
      %c0_39 = arith.constant 0 : index
      %c0_40 = arith.constant 0 : index
      %c0_41 = arith.constant 0 : index
      %60 = vector.load %arg11[%c0_39, %c0_40, %c0_41] : memref<1x8x128xf32, #tpu.memory_space<vmem>>, vector<1x8x128xf32>
      %61 = vector.shape_cast %60 : vector<1x8x128xf32> to vector<8x128xf32>
      %62 = vector.broadcast %59 : f32 to vector<8x128xf32>
      %63 = arith.mulf %62, %61 : vector<8x128xf32>
      %64 = arith.addf %63, %1 : vector<8x128xf32>
      %c0_42 = arith.constant 0 : index
      %c0_43 = arith.constant 0 : index
      %c0_44 = arith.constant 0 : index
      %65 = vector.load %arg11[%c0_42, %c0_43, %c0_44] : memref<1x8x128xf32, #tpu.memory_space<vmem>>, vector<1x8x128xf32>
      %66 = vector.shape_cast %65 : vector<1x8x128xf32> to vector<8x128xf32>
      %67 = vector.shape_cast %64 : vector<8x128xf32> to vector<1x8x128xf32>
      tpu.vector_store %arg11[%c0_42, %c0_43, %c0_44], %67 {strides = array<i32>} : memref<1x8x128xf32, #tpu.memory_space<vmem>>, vector<1x8x128xf32>,
    } else {
    }
    return
  }
  func.func @transform_0(%arg0: i32, %arg1: i32) -> (i32, i32, i32) {
    %c0_i32 = arith.constant 0 : i32
    %c0_i32_0 = arith.constant 0 : i32
    %c0_i32_1 = arith.constant 0 : i32
    return %arg0, %c0_i32, %c0_i32_0 : i32, i32, i32
  }
  func.func @transform_1(%arg0: i32, %arg1: i32) -> (i32, i32, i32) {
    %c0_i32 = arith.constant 0 : i32
    %c0_i32_0 = arith.constant 0 : i32
    return %arg0, %c0_i32, %arg1 : i32, i32, i32
  }
  func.func @transform_2(%arg0: i32, %arg1: i32) -> (i32, i32) {
    %c0_i32 = arith.constant 0 : i32
    %c0_i32_0 = arith.constant 0 : i32
    %c0_i32_1 = arith.constant 0 : i32
    return %c0_i32, %c0_i32_0 : i32, i32
  }
  func.func @transform_3(%arg0: i32, %arg1: i32) -> (i32, i32) {
    %c0_i32 = arith.constant 0 : i32
    %c0_i32_0 = arith.constant 0 : i32
    %c0_i32_1 = arith.constant 0 : i32
    return %c0_i32, %c0_i32_0 : i32, i32
  }
  func.func @transform_4(%arg0: i32, %arg1: i32) -> (i32, i32) {
    %c0_i32 = arith.constant 0 : i32
    %c0_i32_0 = arith.constant 0 : i32
    %c0_i32_1 = arith.constant 0 : i32
    return %c0_i32, %c0_i32_0 : i32, i32
  }
  func.func @transform_5(%arg0: i32, %arg1: i32) -> (i32, i32) {
    %c0_i32 = arith.constant 0 : i32
    %c0_i32_0 = arith.constant 0 : i32
    %c0_i32_1 = arith.constant 0 : i32
    return %c0_i32, %c0_i32_0 : i32, i32
  }
  func.func @transform_6(%arg0: i32, %arg1: i32) -> (i32, i32) {
    %c0_i32 = arith.constant 0 : i32
    %c0_i32_0 = arith.constant 0 : i32
    %c0_i32_1 = arith.constant 0 : i32
    return %c0_i32, %c0_i32_0 : i32, i32
  }
  func.func @transform_7(%arg0: i32, %arg1: i32) -> (i32, i32) {
    %c0_i32 = arith.constant 0 : i32
    %c0_i32_0 = arith.constant 0 : i32
    %c0_i32_1 = arith.constant 0 : i32
    return %c0_i32, %c0_i32_0 : i32, i32
  }
  func.func @transform_8(%arg0: i32, %arg1: i32) -> i32 {
    %c0_i32 = arith.constant 0 : i32
    %c0_i32_0 = arith.constant 0 : i32
    return %c0_i32 : i32
  }
  func.func @transform_9(%arg0: i32, %arg1: i32) -> (i32, i32, i32) {
    %c0_i32 = arith.constant 0 : i32
    %c0_i32_0 = arith.constant 0 : i32
    %c0_i32_1 = arith.constant 0 : i32
    return %arg0, %c0_i32, %c0_i32_0 : i32, i32, i32
  }
  func.func @transform_10(%arg0: i32, %arg1: i32) -> (i32, i32, i32) {
    %c0_i32 = arith.constant 0 : i32
    %c0_i32_0 = arith.constant 0 : i32
    return %arg0, %arg1, %c0_i32 : i32, i32, i32
  }
}

</mosaic_0001>

<bundles_post_ra>
// kernel: tpu_custom_call.1
= control target key start
LH: loop header
LB: loop body
LE: loop exit
PB: predicated region body
PF: predicated region fallthrough
CT: control target
= control target key end

     0   :  { %s2270_s0 = inlined_call_operand.vmem [shape: f32[2,8,128], index: 0, kind: input, shape index: {}]   ;;  %s2271_s1 = inlined_call_operand.vmem [shape: f32[2,8,128], index: 1, kind: input, shape index: {}]   ;;  %s2272_s2 = inlined_call_operand.hbm [shape: f32[8,8], index: 2, kind: input, shape index: {}]   ;;  %s2273_s3 = inlined_call_operand.vmem [shape: f32[8,1], index: 3, kind: input, shape index: {}]   ;;  %s2274_s4 = inlined_call_operand.vmem [shape: f32[8,8], index: 4, kind: input, shape index: {}]   ;;  %s2275_s5 = inlined_call_operand.vmem [shape: f32[8,1], index: 5, kind: input, shape index: {}]   ;;  %s2276_s6 = inlined_call_operand.vmem [shape: f32[8,8], index: 6, kind: input, shape index: {}]   ;;  %s2277_s7 = inlined_call_operand.vmem [shape: f32[8,1], index: 7, kind: input, shape index: {}]   ;;  %s2278_s8 = inlined_call_operand.<no memory space> [shape: f32[1], index: 8, kind: input, shape index: {}]   ;;  %s2279_s9 = inlined_call_operand.hbm [shape: f32[2,8,128], index: 9, kind: output, shape index: {0}]   ;;  %s2280_s10 = inlined_call_operand.hbm [shape: f32[2,128,128], index: 10, kind: output, shape index: {1}]  }
   0x1   :  { %2286 = sst [smem:[#allocation13_spill]] %s2270_s0 }
   0x2   :  { %2287 = sst [smem:[#allocation14_spill]] %s2271_s1 }
   0x3   :  { %16 = sst [smem:[#allocation2]] %s2278_s8 }
   0x4   :  { %17 = vsyncpa [#allocation4], 0 }
   0x5   :  { %18 = vsyncpa [#allocation5], 0 }
   0x6   :  { %20 = vsyncpa [#allocation5 + $0x1], 0 }
   0x7   :  { %21 = vsyncpa [#allocation8], 0 }
   0x8   :  { %23 = vsyncpa [#allocation8 + $0x1], 0  ;;  %s1860_s15 = smov 0   ;;  %s1862_s16 = smov 0  }
   0x9   :  { %s1864_s17 = smov 0   ;;  %s1866_s18 = smov 0  }
   0xa   :  { %s1868_s19 = smov 0   ;;  %s1870_s20 = smov 0  }
   0xb LB: > { %s1328_s8 = sadd.s32 4294967295, %s1791_s20   ;;  %s1329_s21 = sadd.s32 4294967294, %s1791_s20   ;;  %s1791_s20 = sphi %s1870_s20, %s29_s20   ;;  %s1787_s19 = sphi %s1868_s19, %s2305_s19   ;;  %s1783_s18 = sphi %s1866_s18, %s2304_s18   ;;  %s1779_s17 = sphi %s1864_s17, %s2303_s17   ;;  %s1775_s16 = sphi %s1862_s16, %s2302_s16   ;;  %s1771_s15 = sphi %s1860_s15, %s2301_s15  }
   0xc   : > { %s41_s22 = sadd.s32 1, %s1787_s19  ;;  %s249_s23 = sadd.s32 1, %s1779_s17 }
   0xd   : > { %p43_p0 = scmp.ge.s32.totalorder %s41_s22, 2  ;;  %p259_p1 = scmp.ne.s32.totalorder %s1779_s17, %s1775_s16 }
   0xe   : > { %p260_p2 = scmp.eq.s32.totalorder %s1328_s8, 1  ;;  %p265_p3 = scmp.ne.s32.totalorder %s1775_s16, %s1771_s15 }
   0xf   : > { %s2307_s22 = smov (%p43_p0, %s41_s22), 0  ;;  %p266_p5 = scmp.eq.s32.totalorder %s1329_s21, 1 }
  0x10   : > { %2288 = sst [smem:[#allocation12_spill]] %s2307_s22  ;;  %p1900_p4 = por %p260_p2, %p259_p1 }
  0x11   : > { %s246_s25 = ssub.s32 %s1787_s19, %s2307_s22  ;;  %p1330_p6 = scmp.ge.s32.totalorder %s1791_s20, 1 }
  0x12   : > { %s2289_s24 = scalar_select %p1900_p4, 1, 0 }
  0x13   : > { %p247_p7 = scmp.eq.s32.totalorder %s246_s25, 0  ;;  %p1907_p8 = por %p266_p5, %p265_p3 }
  0x14   : > { %p301_p9 = scmp.lt.s32.totalorder %s1791_s20, 3  ;;  %p1919_p11 = scmp.eq.s32.totalorder %s1328_s8, 0 }
  0x15   : > { %s2290_s26 = scalar_select %p1907_p8, 1, 0 }
  0x16   : > { %s1913_s27 = scalar_select %p247_p7, %s1779_s17, %s249_s23  }
  0x17   : > { %p1915_p10 = pnand %p1330_p6, %p301_p9  ;;  %s1793_s30 = smov [#allocation3]  }
  0x18   : > { %s2292_s29 = scalar_select %p1919_p11, 1, 0 }
  0x19   : > { %s2291_s28 = scalar_select %p1915_p10, 1, 0 }
  0x1a   : > { %p1515_p12 = pneg %p1915_p10  ;;  %s314_s11 = sshll.u32 %s1793_s30, 4  ;;  %s315_s11 = int_to_ptr.vmem [resolvable:$true] %s314_s11 }
  0x1b   : > { %s1649_s21 = scalar_lea.hbm %s2272_s2, 128 }
  0x1c   : > { %p1927_p13 = pnand %p1919_p11, %p1515_p12  ;;  %p1650_p0 = scmp.ne.s32.totalorder %s2272_s2, %s1649_s21 }
  0x1d   : > { %p1656_p5 = scmp.lt.u32.totalorder %s1649_s21, %s2272_s2 }
  0x1e   : > { %p1651_p1 = pneg %p1927_p13 }
  0x20   : > { %p1652_p2 = pnand %p1651_p1, %p1650_p0 }
  0x22   : > { %p1653_p3 = pneg %p1652_p2 }
  0x24   : > { %p1658_p6 = pnand %p1656_p5, %p1653_p3 }
  0x26   : > { %1661 = shalt.err (!%p1658_p6)
}
  0x27   : > { %s1662_s22 = scalar_lea.vmem %s315_s11, 128  ;;  %p1670_p8 = scmp.lt.s32.totalorder %s315_s11, %s315_s11 }
  0x28   : > { %p1663_p7 = scmp.ne.s32.totalorder %s315_s11, %s1662_s22  ;;  %p1671_p4 = scmp.lt.s32.totalorder %s1662_s22, %s1662_s22 }
  0x2a   : > { %p1665_p9 = pnand %p1663_p7, %p1651_p1  ;;  %p1672_p11 = por %p1671_p4, %p1670_p8 }
  0x2c   : > { %p1666_p12 = pneg %p1665_p9 }
  0x2e   : > { %p1673_p10 = pnand %p1672_p11, %p1666_p12 }
  0x30   : > { %1676 = shalt.err (!%p1673_p10)
}
  0x31   : > { %1518 = dma.hbm_to_vmem [thread:$0]  (!%p1927_p13), %s2272_s2, 128, %s315_s11, [#allocation4]  }
  0x32   : > { %p2294_p0 = scmp.ne.s32.totalorder %s2291_s28, 0 }
  0x33   : > { %p2295_p2 = scmp.ne.s32.totalorder (!%p2294_p0), %s2292_s29, 0 }
  0x34   : > { %362 = sbr.rel (%p2294_p0) target bundleno = 1239 (0x4d7), region = 56 }
  0x3b   : > { %1758 = dma.done.wait (%p2295_p2), [#allocation4], 128  }
  0x3c   : > { %1760 = vsyncadd (%p2295_p2), [#allocation4], 4294967168  ;;  %p411_p4 = scmp.lt.s32.totalorder %s1783_s18, 1  ;;  %v1794_v0 = vmov 0.0   ;;  %vm1795_vm0 = vmmov 0   ;;  %v1796_v1 = vmov 0   ;;  %v891_v32 = vlaneseq }
  0x3d   : > { %1407 = vmatprep.subr.mxu0 %v1794_v0  ;;  %1412 = vmatprep.subr.mxu1 %v1794_v0  ;;  %s2296_s0 = sld [smem:[#allocation13_spill]]  ;;  %s2297_s1 = sld [smem:[#allocation14_spill]]  ;;  %vm432_vm1 = vcmask 64512   ;;  %v425_v4 = vld [vmem:[%s2274_s4] sm:$0xff] }
  0x3e   : > { %s412_s22 = scalar_select %p411_p4, %s1783_s18, 1  ;;  %1409 = vmatprep.mubr.msk.f32.mxu0 %vm1795_vm0, %v1794_v0  ;;  %1414 = vmatprep.mubr.msk.f32.mxu1 %vm1795_vm0, %v1794_v0  ;;  %v506_v5 = vld [vmem:[#allocation3] sm:$0xff]  ;;  %v2000_v33 = vand.u32 127, %v891_v32 }
  0x3f   : > { %1584 = vset.pattern.permute.xlu0 %v1796_v1  ;;  %v507_v6 = vld [vmem:[%s2273_s3] sm:$0xff]  ;;  %s2136_s8 = sand.u32 1, %s1775_s16   ;;  %s1366_s13 = sshll.u32 %s1783_s18, 11 }
  0x40   : > { %s1337_s28 = sshll.u32 %s412_s22, 3  ;;  %510 = vperm.xlu0 %1584, %v507_v6   ;;  %v426_v7 = vld [vmem:[%s2275_s5] sm:$0xff]  ;;  %vm893_vm2 = vcmp.lt.s32.totalorder %v2000_v33, 64  ;;  %s1168_s29 = scalar_lea.sflag [#allocation8], %s2136_s8 }
  0x41   : > { %v586_v49 = vld [vmem:[%s2276_s6] sm:$0xff]  ;;  %p2298_p10 = scmp.ne.s32.totalorder %s2289_s24, 0 }
  0x43   : > { %s414_s12 = scalar_lea.vmem %s2296_s0, %s1337_s28  ;;  %s421_s23 = scalar_lea.vmem %s2297_s1, %s1337_s28 }
  0x44   : > { %v1967_v2 = vld [vmem:[%s414_s12] sm:$0xff]  ;;  %429 = vperm.xlu0 %1584, %v426_v7   ;;  %s2190_s28 = scalar_lea.hbm %s2280_s10, %s1366_s13  ;;  %s1798_s12 = smov [#allocation7]  }
  0x45   : > { %v424_v3 = vld [vmem:[%s421_s23] sm:$0xff]  ;;  %1408 = vmatpush3.msra.mxu0 %v1967_v2  ;;  %s1336_s23 = sshll.u32 %s2136_s8, 7  ;;  %s1681_s21 = sshll.u32 %s1798_s12, 4  ;;  %s1682_s21 = int_to_ptr.vmem [resolvable:$false] %s1681_s21 }
  0x46   : > { %1413 = vmatpush3.msra.mxu1 %v424_v3  ;;  %1410 = vmatmul.mubr.msk.f32.vlgmr.msra.gmra.mrb[0].mxu0 %vm432_vm1, %v425_v4  ;;  %s2140_s25 = scalar_lea.vmem [#allocation7], %s1336_s23  ;;  %s1683_s23 = scalar_lea.vmem %s1682_s21, 4096 }
  0x47   : > { %1415 = vmatmul.mubr.msk.f32.vlgmr.msra.gmra.mrb[0].mxu1 %vm432_vm1, %v506_v5  ;;  %1417 = vmatprep.subr.mxu0 %v1794_v0  ;;  %s1196_s30 = sshll.u32 %s2140_s25, 4  ;;  %s2184_s30 = int_to_ptr.vmem [resolvable:$true] %s1196_s30 }
  0x48   : > { %1418 = vmatpush3.msra.mxu0 %v424_v3  ;;  %1419 = vmatprep.mubr.msk.f32.mxu0 %vm1795_vm0, %v1794_v0  ;;  %s1677_s11 = scalar_lea.vmem %s2184_s30, 2048  ;;  %p1684_p1 = scmp.lt.s32.totalorder %s2184_s30, %s1682_s21 }
  0x49   : > { %p1678_p8 = scmp.ne.s32.totalorder %s2184_s30, %s1677_s11  ;;  %p1685_p3 = scmp.lt.s32.totalorder %s1683_s23, %s1677_s11 }
  0x4a   : > { %1420 = vmatmul.mubr.msk.f32.vlgmr.msra.gmra.mrb[2].mxu0 %vm432_vm1, %v586_v49 }
  0x4b   : > { %1480 = vmatprep.mubr.msk.f32.mxu0 %vm1795_vm0, %v1794_v0  ;;  %p1679_p11 = pnand %p1678_p8, %p2298_p10  ;;  %p1686_p5 = por %p1685_p3, %p1684_p1 }
  0x4d   : > { %p1680_p13 = pneg %p1679_p11 }
  0x4f   : > { %p1687_p6 = pnand %p1686_p5, %p1680_p13 }
  0xbf   : > { %v511_v8 = vpop.permute.xlu0 %510 }
  0xc3   : > { %v430_v9 = vpop.permute.xlu0 %429 }
 0x119   : > { %v502_v10 = vpop.f32.mrb[0].mxu0 }
 0x11a   : > { %v582_v11 = vpop.f32.mrb[0].mxu1  ;;  %v503_v12 = vadd.f32 %v502_v10, %v430_v9  ;;  %v1411_v15 = vpop.f32.mrb[1].mxu0 }
 0x11b   : > { %v1416_v13 = vpop.f32.mrb[1].mxu1  ;;  %v583_v14 = vadd.f32 %v582_v11, %v511_v8 }
 0x11c   : > { %1422 = vmatprep.subr.mxu1 %v503_v12 }
 0x11d   : > { %666 = vxpose.xlu1.b32.start.end [1/1] (short) %v583_v14, 128  ;;  %1423 = vmatpush3.msra.mxu1 %v503_v12 }
 0x19d   : > { %v682_v16 = vpop.trf.xlu1 }
 0x19e   : > { %1424 = vmatprep.mubr.msk.f32.mxu1 %vm432_vm1, %v682_v16 }
 0x1a1   : > { %v683_v17 = vpop.trf.xlu1 }
 0x1a2   : > { %1425 = vmatmul.mubr.msk.f32.vlgmr.msra.gmra.mrb[2].mxu1 %vm432_vm1, %v683_v17 }
 0x1a5   : > { %v684_v18 = vpop.trf.xlu1 }
 0x1a6   : > { %1427 = vmatprep.mubr.msk.f32.mxu1 %vm432_vm1, %v684_v18 }
 0x1a9   : > { %v685_v19 = vpop.trf.xlu1 }
 0x1aa   : > { %1428 = vmatmul.mubr.msk.f32.gmra.mrb[4].mxu1 %vm432_vm1, %v685_v19 }
 0x1ad   : > { %v686_v20 = vpop.trf.xlu1 }
 0x1ae   : > { %1430 = vmatprep.mubr.msk.f32.mxu1 %vm432_vm1, %v686_v20 }
 0x1b1   : > { %v687_v21 = vpop.trf.xlu1 }
 0x1b2   : > { %1431 = vmatmul.mubr.msk.f32.gmra.mrb[6].mxu1 %vm432_vm1, %v687_v21 }
 0x1b5   : > { %v688_v22 = vpop.trf.xlu1 }
 0x1b6   : > { %1433 = vmatprep.mubr.msk.f32.mxu1 %vm432_vm1, %v688_v22 }
 0x1b9   : > { %v689_v23 = vpop.trf.xlu1 }
 0x1ba   : > { %1434 = vmatmul.mubr.msk.f32.gmra.mrb[8].mxu1 %vm432_vm1, %v689_v23 }
 0x1bd   : > { %v690_v24 = vpop.trf.xlu1 }
 0x1be   : > { %1436 = vmatprep.mubr.msk.f32.mxu1 %vm432_vm1, %v690_v24 }
 0x1c1   : > { %v691_v25 = vpop.trf.xlu1 }
 0x1c2   : > { %1437 = vmatmul.mubr.msk.f32.gmra.mrb[10].mxu1 %vm432_vm1, %v691_v25 }
 0x1c5   : > { %v692_v26 = vpop.trf.xlu1 }
 0x1c6   : > { %1439 = vmatprep.mubr.msk.f32.mxu1 %vm432_vm1, %v692_v26 }
 0x1c9   : > { %v693_v27 = vpop.trf.xlu1 }
 0x1ca   : > { %1440 = vmatmul.mubr.msk.f32.gmra.mrb[12].mxu1 %vm432_vm1, %v693_v27 }
 0x1cd   : > { %v694_v28 = vpop.trf.xlu1 }
 0x1ce   : > { %1442 = vmatprep.mubr.msk.f32.mxu1 %vm432_vm1, %v694_v28 }
 0x1d1   : > { %v695_v29 = vpop.trf.xlu1 }
 0x1d2   : > { %1443 = vmatmul.mubr.msk.f32.gmra.mrb[14].mxu1 %vm432_vm1, %v695_v29 }
 0x1d5   : > { %v696_v30 = vpop.trf.xlu1 }
 0x1d6   : > { %1445 = vmatprep.mubr.msk.f32.mxu1 %vm432_vm1, %v696_v30 }
 0x1d9   : > { %v697_v31 = vpop.trf.xlu1 }
 0x1da   : > { %1446 = vmatmul.mubr.msk.f32.gmra.mrb[16].mxu1 %vm432_vm1, %v697_v31 }
 0x275   : > { %v1426_v34 = vpop.f32.mrb[2].mxu1 }
 0x276   : > { %v812_v35 = vpop.f32.mrb[3].mxu1  ;;  %v895_v36 = vsel %vm893_vm2, %v1426_v34, -1e+30 }
 0x277   : > { %912 = vmax.xlane.f32.xlu0 %v895_v36  ;;  %v894_v37 = vsel %vm893_vm2, %v812_v35, -1e+30 }
 0x278   : > { %910 = vmax.xlane.f32.xlu1 %v894_v37 }
 0x27d   : > { %v1429_v38 = vpop.f32.mrb[4].mxu1 }
 0x27e   : > { %v822_v39 = vpop.f32.mrb[5].mxu1  ;;  %v897_v40 = vsel %vm893_vm2, %v1429_v38, -1e+30 }
 0x27f   : > { %916 = vmax.xlane.f32.xlu0 %v897_v40  ;;  %v896_v41 = vsel %vm893_vm2, %v822_v39, -1e+30 }
 0x283   : > { %914 = vmax.xlane.f32.xlu0 %v896_v41 }
 0x285   : > { %v1432_v42 = vpop.f32.mrb[6].mxu1 }
 0x286   : > { %v832_v43 = vpop.f32.mrb[7].mxu1  ;;  %v899_v44 = vsel %vm893_vm2, %v1432_v42, -1e+30 }
 0x287   : > { %920 = vmax.xlane.f32.xlu0 %v899_v44  ;;  %v898_v45 = vsel %vm893_vm2, %v832_v43, -1e+30 }
 0x28b   : > { %918 = vmax.xlane.f32.xlu0 %v898_v45 }
 0x28d   : > { %v1435_v46 = vpop.f32.mrb[8].mxu1 }
 0x28e   : > { %v842_v47 = vpop.f32.mrb[9].mxu1  ;;  %v2017_v48 = vsel %vm893_vm2, %v1435_v46, -1e+30 }
 0x28f   : > { %924 = vmax.xlane.f32.xlu0 %v2017_v48  ;;  %v2028_v50 = vsel %vm893_vm2, %v842_v47, -1e+30 }
 0x293   : > { %922 = vmax.xlane.f32.xlu0 %v2028_v50 }
 0x295   : > { %v1438_v51 = vpop.f32.mrb[10].mxu1 }
 0x296   : > { %v852_v52 = vpop.f32.mrb[11].mxu1  ;;  %v2033_v53 = vsel %vm893_vm2, %v1438_v51, -1e+30 }
 0x297   : > { %928 = vmax.xlane.f32.xlu0 %v2033_v53  ;;  %v2038_v54 = vsel %vm893_vm2, %v852_v52, -1e+30 }
 0x29b   : > { %926 = vmax.xlane.f32.xlu0 %v2038_v54 }
 0x29d   : > { %v1441_v55 = vpop.f32.mrb[12].mxu1 }
 0x29e   : > { %v862_v56 = vpop.f32.mrb[13].mxu1  ;;  %v2043_v57 = vsel %vm893_vm2, %v1441_v55, -1e+30 }
 0x29f   : > { %932 = vmax.xlane.f32.xlu0 %v2043_v57  ;;  %v2048_v58 = vsel %vm893_vm2, %v862_v56, -1e+30 }
 0x2a3   : > { %930 = vmax.xlane.f32.xlu0 %v2048_v58 }
 0x2a5   : > { %v1444_v59 = vpop.f32.mrb[14].mxu1 }
 0x2a6   : > { %v872_v60 = vpop.f32.mrb[15].mxu1  ;;  %v2053_v61 = vsel %vm893_vm2, %v1444_v59, -1e+30 }
 0x2a7   : > { %936 = vmax.xlane.f32.xlu0 %v2053_v61  ;;  %v2058_v62 = vsel %vm893_vm2, %v872_v60, -1e+30 }
 0x2ab   : > { %934 = vmax.xlane.f32.xlu0 %v2058_v62 }
 0x2ad   : > { %v1447_v63 = vpop.f32.mrb[16].mxu1 }
 0x2ae   : > { %v882_v0 = vpop.f32.mrb[17].mxu1  ;;  %v2068_v3 = vsel %vm893_vm2, %v1447_v63, -1e+30 }
 0x2af   : > { %v2063_v1 = vsel %vm893_vm2, %v882_v0, -1e+30 }
 0x2b0   : > { %938 = vmax.xlane.f32.xlu0 %v2063_v1 }
 0x2b4   : > { %940 = vmax.xlane.f32.xlu0 %v2068_v3 }
 0x304   : > { %v913_v4 = vpop.xlane.xlu0 %912 }
 0x305   : > { %v943_v5 = vsub.f32 %v895_v36, %v913_v4  ;;  %v911_v6 = vpop.xlane.xlu1 %910 }
 0x306   : > { %v942_v7 = vsub.f32 %v894_v37, %v911_v6 }
 0x307   : > { %v960_v8 = vmul.f32 1.442695, %v943_v5 }
 0x308   : > { %v958_v9 = vmul.f32 1.442695, %v942_v7 }
 0x309   : > { %1585 = vpow2.f32 %v960_v8  ;;  %v2133_v8 = vpop.f32.mrb[2].mxu0 }
 0x30a   : > { %1587 = vpow2.f32 %v958_v9  ;;  %v1421_v9 = vpop.f32.mrb[3].mxu0 }
 0x30c   : > { %v917_v10 = vpop.xlane.xlu0 %916 }
 0x30d   : > { %v945_v11 = vsub.f32 %v897_v40, %v917_v10 }
 0x30f   : > { %v964_v12 = vmul.f32 1.442695, %v945_v11 }
 0x310   : > { %v915_v13 = vpop.xlane.xlu0 %914 }
 0x311   : > { %1589 = vpow2.f32 %v964_v12  ;;  %v944_v14 = vsub.f32 %v896_v41, %v915_v13 }
 0x313   : > { %v2071_v15 = vpop.eup %1585  ;;  %v962_v16 = vmul.f32 1.442695, %v944_v14 }
 0x314   : > { %v921_v17 = vpop.xlane.xlu0 %920  ;;  %992 = vadd.xlane.f32.xlu0 %v2071_v15  ;;  %v2074_v19 = vpop.eup %1587 }
 0x315   : > { %1591 = vpow2.f32 %v962_v16  ;;  %v947_v18 = vsub.f32 %v899_v44, %v921_v17 }
 0x317   : > { %v968_v20 = vmul.f32 1.442695, %v947_v18 }
 0x318   : > { %v919_v21 = vpop.xlane.xlu0 %918  ;;  %990 = vadd.xlane.f32.xlu0 %v2074_v19 }
 0x319   : > { %1593 = vpow2.f32 %v968_v20  ;;  %v946_v22 = vsub.f32 %v898_v45, %v919_v21 }
 0x31b   : > { %v2077_v23 = vpop.eup %1589  ;;  %v966_v24 = vmul.f32 1.442695, %v946_v22 }
 0x31c   : > { %996 = vadd.xlane.f32.xlu1 %v2077_v23  ;;  %v925_v25 = vpop.xlane.xlu0 %924 }
 0x31d   : > { %1595 = vpow2.f32 %v966_v24  ;;  %v949_v26 = vsub.f32 %v2017_v48, %v925_v25 }
 0x31f   : > { %v2081_v27 = vpop.eup %1591  ;;  %v972_v28 = vmul.f32 1.442695, %v949_v26 }
 0x320   : > { %v923_v29 = vpop.xlane.xlu0 %922  ;;  %994 = vadd.xlane.f32.xlu0 %v2081_v27 }
 0x321   : > { %1597 = vpow2.f32 %v972_v28  ;;  %v948_v30 = vsub.f32 %v2028_v50, %v923_v29  ;;  %v1797_v50 = vmov 0.0|0.0  }
 0x322   : > { %1483 = vmatprep.subr.bf16.mxu0 %v1797_v50 }
 0x323   : > { %v2085_v31 = vpop.eup %1593  ;;  %v970_v32 = vmul.f32 1.442695, %v948_v30 }
 0x324   : > { %1000 = vadd.xlane.f32.xlu1 %v2085_v31  ;;  %v929_v34 = vpop.xlane.xlu0 %928 }
 0x325   : > { %1599 = vpow2.f32 %v970_v32  ;;  %v951_v35 = vsub.f32 %v2033_v53, %v929_v34 }
 0x327   : > { %v2089_v36 = vpop.eup %1595  ;;  %v976_v37 = vmul.f32 1.442695, %v951_v35 }
 0x328   : > { %v927_v38 = vpop.xlane.xlu0 %926  ;;  %998 = vadd.xlane.f32.xlu0 %v2089_v36 }
 0x329   : > { %1601 = vpow2.f32 %v976_v37  ;;  %v950_v39 = vsub.f32 %v2038_v54, %v927_v38 }
 0x32b   : > { %v2093_v40 = vpop.eup %1597  ;;  %v974_v41 = vmul.f32 1.442695, %v950_v39 }
 0x32c   : > { %1004 = vadd.xlane.f32.xlu1 %v2093_v40  ;;  %v933_v42 = vpop.xlane.xlu0 %932 }
 0x32d   : > { %1603 = vpow2.f32 %v974_v41  ;;  %v953_v43 = vsub.f32 %v2043_v57, %v933_v42 }
 0x32f   : > { %v2097_v44 = vpop.eup %1599  ;;  %v980_v45 = vmul.f32 1.442695, %v953_v43 }
 0x330   : > { %v931_v46 = vpop.xlane.xlu0 %930  ;;  %1002 = vadd.xlane.f32.xlu0 %v2097_v44 }
 0x331   : > { %1605 = vpow2.f32 %v980_v45  ;;  %v952_v47 = vsub.f32 %v2048_v58, %v931_v46 }
 0x333   : > { %v2101_v48 = vpop.eup %1601  ;;  %v978_v49 = vmul.f32 1.442695, %v952_v47 }
 0x334   : > { %1008 = vadd.xlane.f32.xlu1 %v2101_v48  ;;  %v937_v51 = vpop.xlane.xlu0 %936 }
 0x335   : > { %1607 = vpow2.f32 %v978_v49  ;;  %v955_v52 = vsub.f32 %v2053_v61, %v937_v51 }
 0x337   : > { %v2106_v53 = vpop.eup %1603  ;;  %v984_v54 = vmul.f32 1.442695, %v955_v52 }
 0x338   : > { %v935_v55 = vpop.xlane.xlu0 %934  ;;  %1006 = vadd.xlane.f32.xlu0 %v2106_v53 }
 0x339   : > { %1609 = vpow2.f32 %v984_v54  ;;  %v954_v56 = vsub.f32 %v2058_v62, %v935_v55 }
 0x33b   : > { %v2110_v57 = vpop.eup %1605  ;;  %v982_v58 = vmul.f32 1.442695, %v954_v56 }
 0x33c   : > { %1012 = vadd.xlane.f32.xlu1 %v2110_v57 }
 0x33d   : > { %1611 = vpow2.f32 %v982_v58  ;;  %v939_v59 = vpop.xlane.xlu0 %938 }
 0x33e   : > { %v956_v60 = vsub.f32 %v2063_v1, %v939_v59 }
 0x33f   : > { %v2114_v63 = vpop.eup %1607 }
 0x340   : > { %v986_v61 = vmul.f32 1.442695, %v956_v60  ;;  %1010 = vadd.xlane.f32.xlu0 %v2114_v63 }
 0x341   : > { %v941_v0 = vpop.xlane.xlu0 %940 }
 0x342   : > { %1613 = vpow2.f32 %v986_v61  ;;  %v957_v4 = vsub.f32 %v2068_v3, %v941_v0  ;;  %v587_v3 = vld [vmem:[%s2277_s7] sm:$0xff] }
 0x343   : > { %v2118_v5 = vpop.eup %1609 }
 0x344   : > { %v988_v62 = vmul.f32 1.442695, %v957_v4  ;;  %1016 = vadd.xlane.f32.xlu1 %v2118_v5 }
 0x346   : > { %1615 = vpow2.f32 %v988_v62 }
 0x347   : > { %v2121_v6 = vpop.eup %1611 }
 0x348   : > { %1014 = vadd.xlane.f32.xlu0 %v2121_v6 }
 0x34c   : > { %v2124_v1 = vpop.eup %1613 }
 0x34d   : > { %1018 = vadd.xlane.f32.xlu0 %v2124_v1 }
 0x350   : > { %v2127_v7 = vpop.eup %1615 }
 0x351   : > { %1020 = vadd.xlane.f32.xlu1 %v2127_v7 }
 0x363   : > { %590 = vperm.xlu0 %1584, %v587_v3  }
 0x3a1   : > { %v993_v10 = vpop.xlane.xlu0 %992 }
 0x3a2   : > { %1617 = vrcp.f32 %v993_v10 }
 0x3a5   : > { %v991_v11 = vpop.xlane.xlu0 %990 }
 0x3a6   : > { %1619 = vrcp.f32 %v991_v11 }
 0x3a9   : > { %v997_v12 = vpop.xlane.xlu1 %996 }
 0x3aa   : > { %1621 = vrcp.f32 %v997_v12 }
 0x3ac   : > { %v1618_v13 = vpop.eup %1617 }
 0x3ad   : > { %v995_v14 = vpop.xlane.xlu0 %994  ;;  %v1039_v16 = vmul.f32 %v1618_v13, %v2071_v15 }
 0x3ae   : > { %1623 = vrcp.f32 %v995_v14 }
 0x3af   : > { %1055 = vst [vmem:[%s2140_s25 + $0x8] sm:$0xff] %v1039_v16 }
 0x3b0   : > { %v1620_v17 = vpop.eup %1619 }
 0x3b1   : > { %v1001_v18 = vpop.xlane.xlu1 %1000  ;;  %v1038_v20 = vmul.f32 %v1620_v17, %v2074_v19 }
 0x3b2   : > { %1625 = vrcp.f32 %v1001_v18 }
 0x3b3   : > { %v1484_v21 = vpack.c.bf16 %v1039_v16, %v1038_v20  ;;  %1054 = vst [vmem:[%s2140_s25] sm:$0xff] %v1038_v20 }
 0x3b4   : > { %v1622_v22 = vpop.eup %1621 }
 0x3b5   : > { %1485 = vmatpush3.bf16.msra.mxu0 %v1484_v21  ;;  %v999_v24 = vpop.xlane.xlu0 %998  ;;  %v1041_v15 = vmul.f32 %v1622_v22, %v2077_v23 }
 0x3b6   : > { %1627 = vrcp.f32 %v999_v24  ;;  %1486 = vmatprep.subr.bf16.mxu0 %v1797_v50 }
 0x3b7   : > { %1057 = vst [vmem:[%s2140_s25 + $0x18] sm:$0xff] %v1041_v15 }
 0x3b8   : > { %v1624_v25 = vpop.eup %1623 }
 0x3b9   : > { %v1005_v26 = vpop.xlane.xlu1 %1004  ;;  %v1040_v28 = vmul.f32 %v1624_v25, %v2081_v27 }
 0x3ba   : > { %1629 = vrcp.f32 %v1005_v26 }
 0x3bb   : > { %v1487_v19 = vpack.c.bf16 %v1041_v15, %v1040_v28  ;;  %1056 = vst [vmem:[%s2140_s25 + $0x10] sm:$0xff] %v1040_v28 }
 0x3bc   : > { %v1626_v29 = vpop.eup %1625 }
 0x3bd   : > { %1488 = vmatpush3.bf16.msra.mxu0 %v1487_v19  ;;  %v1003_v30 = vpop.xlane.xlu0 %1002  ;;  %v1043_v32 = vmul.f32 %v1626_v29, %v2085_v31 }
 0x3be   : > { %1631 = vrcp.f32 %v1003_v30  ;;  %1489 = vmatprep.subr.bf16.mxu0 %v1797_v50 }
 0x3bf   : > { %1059 = vst [vmem:[%s2140_s25 + $0x28] sm:$0xff] %v1043_v32 }
 0x3c0   : > { %v1628_v23 = vpop.eup %1627 }
 0x3c1   : > { %v1009_v34 = vpop.xlane.xlu1 %1008  ;;  %v1042_v35 = vmul.f32 %v1628_v23, %v2089_v36 }
 0x3c2   : > { %1633 = vrcp.f32 %v1009_v34 }
 0x3c3   : > { %v1490_v27 = vpack.c.bf16 %v1043_v32, %v1042_v35  ;;  %1058 = vst [vmem:[%s2140_s25 + $0x20] sm:$0xff] %v1042_v35 }
 0x3c4   : > { %v1630_v37 = vpop.eup %1629 }
 0x3c5   : > { %1491 = vmatpush3.bf16.msra.mxu0 %v1490_v27  ;;  %v1007_v38 = vpop.xlane.xlu0 %1006  ;;  %v1045_v39 = vmul.f32 %v1630_v37, %v2093_v40 }
 0x3c6   : > { %1635 = vrcp.f32 %v1007_v38  ;;  %1492 = vmatprep.subr.bf16.mxu0 %v1797_v50 }
 0x3c7   : > { %1061 = vst [vmem:[%s2140_s25 + $0x38] sm:$0xff] %v1045_v39 }
 0x3c8   : > { %v1632_v31 = vpop.eup %1631 }
 0x3c9   : > { %v1013_v41 = vpop.xlane.xlu1 %1012  ;;  %v1044_v42 = vmul.f32 %v1632_v31, %v2097_v44 }
 0x3ca   : > { %1637 = vrcp.f32 %v1013_v41 }
 0x3cb   : > { %v1493_v36 = vpack.c.bf16 %v1045_v39, %v1044_v42  ;;  %1060 = vst [vmem:[%s2140_s25 + $0x30] sm:$0xff] %v1044_v42 }
 0x3cc   : > { %v1634_v43 = vpop.eup %1633 }
 0x3cd   : > { %1494 = vmatpush3.bf16.msra.mxu0 %v1493_v36  ;;  %v1011_v45 = vpop.xlane.xlu0 %1010  ;;  %v1047_v46 = vmul.f32 %v1634_v43, %v2101_v48 }
 0x3ce   : > { %1639 = vrcp.f32 %v1011_v45  ;;  %1495 = vmatprep.subr.bf16.mxu0 %v1797_v50 }
 0x3cf   : > { %1063 = vst [vmem:[%s2140_s25 + $0x48] sm:$0xff] %v1047_v46 }
 0x3d0   : > { %v1636_v40 = vpop.eup %1635 }
 0x3d1   : > { %v1017_v47 = vpop.xlane.xlu1 %1016  ;;  %v1046_v49 = vmul.f32 %v1636_v40, %v2106_v53 }
 0x3d2   : > { %1641 = vrcp.f32 %v1017_v47 }
 0x3d3   : > { %v1496_v44 = vpack.c.bf16 %v1047_v46, %v1046_v49  ;;  %1062 = vst [vmem:[%s2140_s25 + $0x40] sm:$0xff] %v1046_v49 }
 0x3d4   : > { %v1638_v51 = vpop.eup %1637 }
 0x3d5   : > { %1497 = vmatpush3.bf16.msra.mxu0 %v1496_v44  ;;  %v1015_v52 = vpop.xlane.xlu0 %1014  ;;  %v1049_v54 = vmul.f32 %v1638_v51, %v2110_v57 }
 0x3d6   : > { %1643 = vrcp.f32 %v1015_v52  ;;  %1498 = vmatprep.subr.bf16.mxu0 %v1797_v50 }
 0x3d7   : > { %1065 = vst [vmem:[%s2140_s25 + $0x58] sm:$0xff] %v1049_v54 }
 0x3d8   : > { %v1640_v48 = vpop.eup %1639 }
 0x3d9   : > { %v1048_v55 = vmul.f32 %v1640_v48, %v2114_v63 }
 0x3da   : > { %v1019_v56 = vpop.xlane.xlu0 %1018 }
 0x3db   : > { %1645 = vrcp.f32 %v1019_v56  ;;  %v1499_v53 = vpack.c.bf16 %v1049_v54, %v1048_v55  ;;  %1064 = vst [vmem:[%s2140_s25 + $0x50] sm:$0xff] %v1048_v55 }
 0x3dc   : > { %v1642_v58 = vpop.eup %1641 }
 0x3dd   : > { %1500 = vmatpush3.bf16.msra.mxu0 %v1499_v53  ;;  %v1051_v59 = vmul.f32 %v1642_v58, %v2118_v5 }
 0x3de   : > { %v1021_v60 = vpop.xlane.xlu1 %1020  ;;  %1501 = vmatprep.subr.bf16.mxu0 %v1797_v50 }
 0x3df   : > { %1647 = vrcp.f32 %v1021_v60  ;;  %1067 = vst [vmem:[%s2140_s25 + $0x68] sm:$0xff] %v1051_v59 }
 0x3e0   : > { %v1644_v57 = vpop.eup %1643 }
 0x3e1   : > { %v1050_v61 = vmul.f32 %v1644_v57, %v2121_v6 }
 0x3e2   : > { %v591_v3 = vpop.permute.xlu0 %590 }
 0x3e3   : > { %v1502_v63 = vpack.c.bf16 %v1051_v59, %v1050_v61  ;;  %1066 = vst [vmem:[%s2140_s25 + $0x60] sm:$0xff] %v1050_v61  ;;  %v663_v6 = vadd.f32 %v2133_v8, %v591_v3 }
 0x3e5   : > { %v1646_v0 = vpop.eup %1645  ;;  %1503 = vmatpush3.bf16.msra.mxu0 %v1502_v63 }
 0x3e6   : > { %1504 = vmatprep.subr.bf16.mxu0 %v1797_v50  ;;  %v1052_v4 = vmul.f32 %v1646_v0, %v2124_v1 }
 0x3e8   : > { %1068 = vst [vmem:[%s2140_s25 + $0x70] sm:$0xff] %v1052_v4 }
 0x3e9   : > { %v1648_v5 = vpop.eup %1647 }
 0x3ea   : > { %v1053_v62 = vmul.f32 %v1648_v5, %v2127_v7 }
 0x3ec   : > { %v1505_v9 = vpack.c.bf16 %v1053_v62, %v1052_v4  ;;  %1069 = vst [vmem:[%s2140_s25 + $0x78] sm:$0xff] %v1053_v62 }
 0x3ee   : > { %1506 = vmatpush3.bf16.msra.mxu0 %v1505_v9 }
 0x3f1   : > { %1481 = vmatmul.mubr.msk.f32.vlgmr.msra.gmra.mrb[4].mxu0 %vm893_vm2, %v663_v6 }
 0x3f2   : > { %1690 = shalt.err (!%p1687_p6)
}
 0x3f3   : > { %s1691_s25 = scalar_lea.hbm %s2190_s28, 2048  ;;  %s1695_s22 = scalar_lea.hbm %s2280_s10, 4096 }
 0x3f4   : > { %p1692_p7 = scmp.ne.s32.totalorder %s2190_s28, %s1691_s25  ;;  %p1696_p0 = scmp.lt.u32.totalorder %s2190_s28, %s2280_s10 }
 0x3f5   : > { %p1697_p2 = scmp.lt.u32.totalorder %s1695_s22, %s1691_s25  ;;  %p1699_p8 = scmp.lt.u32.totalorder %s1691_s25, %s2190_s28 }
 0x3f6   : > { %p1693_p9 = pnand %p1692_p7, %p2298_p10 }
 0x3f7   : > { %p1698_p4 = por %p1697_p2, %p1696_p0 }
 0x3f8   : > { %p1694_p12 = pneg %p1693_p9 }
 0x3f9   : > { %p1700_p11 = por %p1699_p8, %p1698_p4 }
 0x3fb   : > { %p1701_p13 = pnand %p1700_p11, %p1694_p12 }
 0x3fd   : > { %1704 = shalt.err (!%p1701_p13)
}
 0x3fe   : > { %s1799_s11 = smov 128   ;;  %s1800_s23 = smov 8  }
 0x3ff   : > { %1512 = dma.vmem_to_hbm [thread:$0]  (%p2298_p10), %s2184_s30, 2048, %s2190_s28, %s1168_s29, %s1799_s11, %s1799_s11, %s1800_s23  }
 0x400   : > { %s1156_s13 = sld [smem:[#allocation2]]  ;;  %s1335_s14 = sshll.u32 %s2136_s8, 3 }
 0x401   : > { %s1361_s25 = sshll.u32 %s1783_s18, 7  ;;  %s403_s22 = scalar_lea.vmem [#allocation6], %s1335_s14 }
 0x402   : > { %s1181_s12 = sshll.u32 %s403_s22, 4  ;;  %s2222_s1 = scalar_lea.hbm %s2279_s9, %s1361_s25  ;;  %s2224_s12 = int_to_ptr.vmem [resolvable:$true] %s1181_s12 }
 0x403   : > { %s1163_s30 = scalar_lea.sflag [#allocation5], %s2136_s8  ;;  %s1705_s28 = scalar_lea.vmem %s2224_s12, 128 }
 0x404   : > { %p1706_p1 = scmp.ne.s32.totalorder %s2224_s12, %s1705_s28  ;;  %s1801_s18 = smov [#allocation6]  }
 0x405   : > { %s1709_s29 = sshll.u32 %s1801_s18, 4  ;;  %s1710_s29 = int_to_ptr.vmem [resolvable:$false] %s1709_s29 }
 0x406   : > { %v1158_v50 = vstv %s1156_s13  ;;  %p1707_p3 = pnand %p1706_p1, %p2298_p10  ;;  %s1711_s11 = scalar_lea.vmem %s1710_s29, 256 }
 0x407   : > { %p1712_p6 = scmp.lt.s32.totalorder %s2224_s12, %s1710_s29  ;;  %p1713_p7 = scmp.lt.s32.totalorder %s1711_s11, %s1705_s28 }
 0x408   : > { %p1708_p5 = pneg %p1707_p3 }
 0x409   : > { %p1714_p9 = por %p1713_p7, %p1712_p6 }
 0x40b   : > { %p1715_p12 = pnand %p1714_p9, %p1708_p5 }
 0x4c4   : > { %v1141_v33 = vpop.f32.mrb[4].mxu0 }
 0x4c5   : > { %v1482_v1 = vpop.f32.mrb[5].mxu0  ;;  %v1159_v7 = vmul.f32 %v1158_v50, %v1141_v33 }
 0x4c7   : > { %v1160_v8 = vadd.f32 %v1159_v7, %v1967_v2 }
 0x4c9   : > { %1161 = vst [vmem:[%s403_s22] sm:$0xff] %v1160_v8 }
 0x4ca   : > { %1718 = shalt.err (!%p1715_p12)
}
 0x4cb   : > { %s1719_s0 = scalar_lea.hbm %s2222_s1, 128  ;;  %s1723_s13 = scalar_lea.hbm %s2279_s9, 256 }
 0x4cc   : > { %p1720_p0 = scmp.ne.s32.totalorder %s2222_s1, %s1719_s0  ;;  %p1724_p8 = scmp.lt.u32.totalorder %s2222_s1, %s2279_s9 }
 0x4cd   : > { %p1725_p11 = scmp.lt.u32.totalorder %s1723_s13, %s1719_s0  ;;  %p1727_p1 = scmp.lt.u32.totalorder %s1719_s0, %s2222_s1 }
 0x4ce   : > { %p1721_p2 = pnand %p1720_p0, %p2298_p10 }
 0x4cf   : > { %p1726_p13 = por %p1725_p11, %p1724_p8 }
 0x4d0   : > { %p1722_p4 = pneg %p1721_p2 }
 0x4d1   : > { %p1728_p3 = por %p1727_p1, %p1726_p13 }
 0x4d3   : > { %p1729_p5 = pnand %p1728_p3, %p1722_p4 }
 0x4d5   : > { %1732 = shalt.err (!%p1729_p5)
}
 0x4d6   : > { %1511 = dma.vmem_to_hbm [thread:$0]  (%p2298_p10), %s2224_s12, 128, %s2222_s1, %s1163_s30  }
 0x4d7 PF: > { %p1528_p6 = scmp.ge.s32.totalorder %s1791_s20, 2  ;;  %s1211_s22 = sand.u32 1, %s1771_s15  }
 0x4d8   : > { %p2299_p7 = scmp.ne.s32.totalorder %s2290_s26, 0  ;;  %s1212_s21 = scalar_lea.sflag [#allocation5], %s1211_s22 }
 0x4da   : > { %p1520_p9 = pnand %p1528_p6, %p2299_p7 }
 0x4dc   : > { %1762 = dma.done.wait (!%p1520_p9), %s1212_s21, 128  }
 0x4dd   : > { %1764 = vsyncadd (!%p1520_p9), %s1212_s21, 4294967168  ;;  %s1221_s28 = scalar_lea.sflag [#allocation8], %s1211_s22 }
 0x4de   : > { %1766 = dma.done.wait (!%p1520_p9), %s1221_s28, 2048  }
 0x4df   : > { %1768 = vsyncadd (!%p1520_p9), %s1221_s28, 4294965248  ;;  %s29_s20 = sadd.s32 1, %s1791_s20   ;;  %s2300_s1 = sld [smem:[#allocation12_spill]] }
 0x4e0   : > { %p26_p12 = scmp.ge.s32.totalorder %s29_s20, 4   ;;  %s2301_s15 = smov %s1775_s16 }
 0x4e1   : > { %s2302_s16 = smov %s1779_s17  ;;  %s2303_s17 = smov %s1913_s27 }
 0x4e2   : > { %s2304_s18 = smov %s1787_s19  ;;  %28 = sbr.rel (!%p26_p12) target bundleno = 11 (0xb), region = 124 }
 0x4e5   : > { %s2305_s19 = smov %s2300_s1 }
 0x4e9   :  { %1226 = vsyncpa [#allocation4], 1 }
 0x4ea   :  { %1228 = vsyncpa [#allocation4 + $0x1], 1 }
 0x4eb   :  { %1229 = vsyncpa [#allocation5], 1 }
 0x4ec   :  { %1231 = vsyncpa [#allocation5 + $0x1], 1 }
 0x4ed   :  { %1232 = vsyncpa [#allocation8], 1 }
 0x4ee   :  { %1234 = vsyncpa [#allocation8 + $0x1], 1 }

</bundles_post_ra>
